<compile_context>
chip_gen: v7x
topology: tpu7x:2x2x1
jax: 0.10.0
libtpu: 0.0.40
codegen_flags: <defaults>
</compile_context>

<pallas_src>
import functools

import jax
import jax.numpy as jnp
from jax.experimental import pallas as pl
from jax.experimental.pallas import tpu as pltpu


def _ce_partial_kernel(logits_ref, targets_ref, out_ref, *,
                       n_valid, tile_m, tiles_per_split):
    s = pl.program_id(0)                       # row-group (parallel -> megacore)
    i = pl.program_id(1)                       # tile within the row-group
    tile_idx = s * tiles_per_split + i         # logical tile index

    @pl.when(i == 0)
    def _init():
        out_ref[...] = jnp.zeros_like(out_ref)

    x = logits_ref[...].astype(jnp.float32)    # (tile_m, C), f32 in VMEM
    t = targets_ref[...]                       # (tile_m, 1) int32

    # gather the logit at the target class via one-hot compare + lane reduce.
    # (1, C) iota broadcast by the compare -- no (tile_m, C) int32 tile.
    col = jax.lax.broadcasted_iota(jnp.int32, (1, x.shape[1]), 1)
    picked = jnp.sum(jnp.where(col == t, x, 0.0), axis=-1, keepdims=True)

    # numerically-stable logsumexp over the class (lane) axis
    m = jnp.max(x, axis=-1, keepdims=True)
    ssum = jnp.sum(jnp.exp(x - m), axis=-1, keepdims=True)

    # fused per-row loss: lse - picked == (m - picked) + log(sum exp(x - m))
    per_row = (m - picked) + jnp.log(ssum)     # (tile_m, 1)

    # Only the overhang tile (and the phantom clamped tile of the megacore split)
    # pays for the row-validity mask; interior tiles take the cheap path.
    is_full = (tile_idx + 1) * tile_m <= n_valid

    @pl.when(is_full)
    def _acc_full():
        out_ref[...] += jnp.sum(per_row)

    @pl.when(jnp.logical_not(is_full))
    def _acc_masked():
        row = tile_idx * tile_m + jax.lax.broadcasted_iota(
            jnp.int32, per_row.shape, 0)
        out_ref[...] += jnp.sum(jnp.where(row < n_valid, per_row, 0.0))


def _round_up(x, m):
    return ((x + m - 1) // m) * m


def _vmem_capacity_bytes():
    """Physical per-core VMEM; conservative v7x fallback if the query fails."""
    try:
        cap = int(pltpu.get_tpu_info().vmem_capacity_bytes)
        if cap >= 16 * 1024 * 1024:
            return cap
    except Exception:
        pass
    return 64 * 1024 * 1024


def _pick_tile_m(n, num_classes, itemsize, budget_bytes, cap=None):
    """Largest row tile whose resident VMEM (double-buffered inputs + live f32
    full-tile temporaries + lane-padded target buffers) fits the budget."""
    sub = 16 if itemsize == 2 else (32 if itemsize == 1 else 8)
    per_row = (
        2 * num_classes * itemsize   # double-buffered logits blocks
        + 2 * 512                    # double-buffered (row,1) int32 targets (lane-padded)
        + 16 * num_classes           # ~4 live f32 full-tile temporaries
    )
    tile_m = budget_bytes // max(per_row, 1)
    tile_m = min(tile_m, 65536, _round_up(n, sub))
    if cap is not None:
        tile_m = min(tile_m, cap)
    tile_m = max(sub, (tile_m // sub) * sub)
    return tile_m


def attention_loss(predicts, targets, *, tile_m_cap=None):
    """predicts: [B, T, C] float; targets: [B, T] int. Returns {'loss': scalar}."""
    B, T, C = predicts.shape
    n = B * T

    # keep the HBM dtype of predicts (no f32 copy); cast happens in-kernel.
    logits = predicts.reshape(n, C)
    tgt = targets.reshape(n, 1).astype(jnp.int32)
    itemsize = jnp.dtype(logits.dtype).itemsize

    vmem_cap = _vmem_capacity_bytes()
    vmem_limit = min((vmem_cap * 3) // 4, 96 * 1024 * 1024)   # ~48 MiB v7x, ~96 MiB v5e/v6e
    budget = (vmem_limit * 17) // 20                           # 85% -> compiler headroom

    tile_m = _pick_tile_m(n, C, itemsize, budget, cap=tile_m_cap)
    num_blocks = pl.cdiv(n, tile_m)

    # Unconditional two-way split: v7x's two TensorCores each stream ~half the
    # tiles; odd tile counts get one clamped phantom tile that the row mask
    # neutralizes. Harmless (size-1/2 outer loop) on single-core chips.
    n_splits = 2 if num_blocks >= 2 else 1
    tiles_per_split = pl.cdiv(num_blocks, n_splits)
    last_block = num_blocks - 1

    kernel = functools.partial(_ce_partial_kernel, n_valid=n, tile_m=tile_m,
                               tiles_per_split=tiles_per_split)

    def in_map(s, i):
        return (jnp.minimum(s * tiles_per_split + i, last_block), 0)

    cost = pl.CostEstimate(
        flops=6 * n * C,
        transcendentals=n * C + n,
        bytes_accessed=n * C * itemsize + n * 512 + n_splits * 8 * 128 * 4,
    )

    partials = pl.pallas_call(
        kernel,
        out_shape=jax.ShapeDtypeStruct((n_splits, 8, 128), jnp.float32),
        grid_spec=pltpu.PrefetchScalarGridSpec(
            num_scalar_prefetch=0,
            grid=(n_splits, tiles_per_split),
            in_specs=[
                pl.BlockSpec((tile_m, C), in_map),
                pl.BlockSpec((tile_m, 1), in_map),
            ],
            out_specs=pl.BlockSpec((1, 8, 128), lambda s, i: (s, 0, 0)),
        ),
        compiler_params=pltpu.CompilerParams(
            dimension_semantics=("parallel", "arbitrary"),
            vmem_limit_bytes=int(vmem_limit)),
        cost_estimate=cost,
    )(logits, tgt)

    # tiny final reduction over the per-split partial sums
    return {"loss": jnp.sum(partials[:, 0, 0])}


def _reference_loss(predicts, targets):
    B, T, C = predicts.shape
    x = predicts.reshape(-1, C).astype(jnp.float32)
    t = targets.reshape(-1).astype(jnp.int32)
    lse = jax.scipy.special.logsumexp(x, axis=-1)
    picked = jnp.take_along_axis(x, t[:, None], axis=-1)[:, 0]
    return jnp.sum(lse - picked)


if __name__ == "__main__":
    key = jax.random.PRNGKey(0)
    k1, k2, k3, k4, k5, k6 = jax.random.split(key, 6)

    # --- 1) small case matching the module's expected layout (single block) ---
    B, T, C = 2, 8, 32
    predicts = jax.random.normal(k1, (B, T, C), dtype=jnp.float32)
    targets = jax.random.randint(k2, (B, T), 0, C, dtype=jnp.int32)
    loss = jax.block_until_ready(attention_loss(predicts, targets)["loss"])
    ref = _reference_loss(predicts, targets)
    assert jnp.allclose(loss, ref, rtol=1e-5, atol=1e-4), (loss, ref)

    # --- 2) larger case: default sizing (one big tile), then a capped run that
    #         forces an odd multi-block grid (clamped phantom tile + overhang) ---
    B2, T2, C2 = 8, 200, 64
    predicts2 = jax.random.normal(k3, (B2, T2, C2), dtype=jnp.float32)
    targets2 = jax.random.randint(k4, (B2, T2), 0, C2, dtype=jnp.int32)
    ref2 = _reference_loss(predicts2, targets2)
    loss2a = jax.block_until_ready(attention_loss(predicts2, targets2)["loss"])
    assert jnp.allclose(loss2a, ref2, rtol=1e-4, atol=1e-2), (loss2a, ref2)
    loss2b = jax.block_until_ready(
        attention_loss(predicts2, targets2, tile_m_cap=384)["loss"])
    assert jnp.allclose(loss2b, ref2, rtol=1e-4, atol=1e-2), (loss2b, ref2)

    # --- 3) bf16 logits, C not a multiple of 128, odd block count + overhang ---
    B3, T3, C3 = 4, 80, 100
    predicts3 = jax.random.normal(k5, (B3, T3, C3),
                                  dtype=jnp.float32).astype(jnp.bfloat16)
    targets3 = jax.random.randint(k6, (B3, T3), 0, C3, dtype=jnp.int32)
    ref3 = _reference_loss(predicts3, targets3)
    loss3 = jax.block_until_ready(
        attention_loss(predicts3, targets3, tile_m_cap=48)["loss"])
    assert jnp.allclose(loss3, ref3, rtol=2e-4, atol=0.5), (loss3, ref3)

    print("KERNEL_OK")
</pallas_src>

<mosaic_0001>
module attributes {stable_mosaic.version = 11 : i64} {
  func.func @_ce_partial_kernel(%arg0: i32, %arg1: i32, %arg2: memref<16x32xf32, #tpu.memory_space<vmem>>, %arg3: memref<16x1xi32, #tpu.memory_space<vmem>>, %arg4: memref<1x8x128xf32, #tpu.memory_space<vmem>>) attributes {dimension_semantics = [#tpu.dimension_semantics<parallel>, #tpu.dimension_semantics<arbitrary>], iteration_bounds = array<i64: 1, 1>, scalar_prefetch = 0 : i64, scratch_operands = 0 : i64, tpu.core_type = #tpu.core_type<tc>, window_params = [{transform_indices = @transform_0, window_bounds = array<i64: 16, 32>}, {transform_indices = @transform_1, window_bounds = array<i64: 16, 1>}, {transform_indices = @transform_2, window_bounds = array<i64: 1, 8, 128>}]} {
    %c1_i32 = arith.constant 1 : i32
    %0 = arith.muli %arg0, %c1_i32 : i32
    %1 = arith.addi %0, %arg1 : i32
    %c0_i32 = arith.constant 0 : i32
    %2 = arith.cmpi eq, %arg1, %c0_i32 : i32
    %3 = arith.extui %2 : i1 to i32
    %c0_i32_0 = arith.constant 0 : i32
    %4 = arith.cmpi ne, %3, %c0_i32_0 : i32
    scf.if %4 {
      %cst_11 = arith.constant 0.000000e+00 : f32
      %33 = vector.broadcast %cst_11 : f32 to vector<1x8x128xf32>
      %c0_12 = arith.constant 0 : index
      %c0_13 = arith.constant 0 : index
      %c0_14 = arith.constant 0 : index
      %34 = vector.load %arg4[%c0_12, %c0_13, %c0_14] : memref<1x8x128xf32, #tpu.memory_space<vmem>>, vector<1x8x128xf32>
      tpu.vector_store %arg4[%c0_12, %c0_13, %c0_14], %33 {strides = array<i32>} : memref<1x8x128xf32, #tpu.memory_space<vmem>>, vector<1x8x128xf32>,
    } else {
    }
    %c0 = arith.constant 0 : index
    %c0_1 = arith.constant 0 : index
    %5 = vector.load %arg2[%c0, %c0_1] : memref<16x32xf32, #tpu.memory_space<vmem>>, vector<16x32xf32>
    %c0_2 = arith.constant 0 : index
    %c0_3 = arith.constant 0 : index
    %6 = vector.load %arg3[%c0_2, %c0_3] : memref<16x1xi32, #tpu.memory_space<vmem>>, vector<16x1xi32>
    %7 = tpu.iota {dimensions = array<i32: 1>} : vector<1x32xi32>
    %8 = vector.broadcast %7 : vector<1x32xi32> to vector<16x32xi32>
    %9 = vector.broadcast %6 : vector<16x1xi32> to vector<16x32xi32>
    %10 = arith.cmpi eq, %8, %9 : vector<16x32xi32>
    %cst = arith.constant 0.000000e+00 : f32
    %11 = vector.broadcast %cst : f32 to vector<16x32xf32>
    %12 = arith.select %10, %5, %11 : vector<16x32xi1>, vector<16x32xf32>
    %cst_4 = arith.constant dense<0.000000e+00> : vector<16xf32>
    %13 = vector.multi_reduction <add>, %12, %cst_4 [1] : vector<16x32xf32> to vector<16xf32>
    %14 = vector.shape_cast %13 : vector<16xf32> to vector<16x1xf32>
    %cst_5 = arith.constant dense<0xFF800000> : vector<16xf32>
    %15 = vector.multi_reduction <maximumf>, %5, %cst_5 [1] : vector<16x32xf32> to vector<16xf32>
    %16 = vector.shape_cast %15 : vector<16xf32> to vector<16x1xf32>
    %17 = vector.broadcast %16 : vector<16x1xf32> to vector<16x32xf32>
    %18 = arith.subf %5, %17 : vector<16x32xf32>
    %19 = math.exp %18 : vector<16x32xf32>
    %cst_6 = arith.constant dense<0.000000e+00> : vector<16xf32>
    %20 = vector.multi_reduction <add>, %19, %cst_6 [1] : vector<16x32xf32> to vector<16xf32>
    %21 = vector.shape_cast %20 : vector<16xf32> to vector<16x1xf32>
    %22 = arith.subf %16, %14 : vector<16x1xf32>
    %23 = math.log %21 : vector<16x1xf32>
    %24 = arith.addf %22, %23 : vector<16x1xf32>
    %c1_i32_7 = arith.constant 1 : i32
    %25 = arith.addi %1, %c1_i32_7 : i32
    %c16_i32 = arith.constant 16 : i32
    %26 = arith.muli %25, %c16_i32 : i32
    %c16_i32_8 = arith.constant 16 : i32
    %27 = arith.cmpi sle, %26, %c16_i32_8 : i32
    %28 = arith.extui %27 : i1 to i32
    %c0_i32_9 = arith.constant 0 : i32
    %29 = arith.cmpi ne, %28, %c0_i32_9 : i32
    scf.if %29 {
      %c0_11 = arith.constant 0 : index
      %c0_12 = arith.constant 0 : index
      %c0_13 = arith.constant 0 : index
      %33 = vector.load %arg4[%c0_11, %c0_12, %c0_13] : memref<1x8x128xf32, #tpu.memory_space<vmem>>, vector<1x8x128xf32>
      %34 = vector.shape_cast %24 : vector<16x1xf32> to vector<1x16x1xf32>
      %cst_14 = arith.constant dense<0.000000e+00> : vector<1xf32>
      %35 = vector.multi_reduction <add>, %34, %cst_14 [1, 2] : vector<1x16x1xf32> to vector<1xf32>
      %36 = vector.shape_cast %35 : vector<1xf32> to vector<1x1x1xf32>
      %37 = vector.extract %36[0, 0, 0] : f32 from vector<1x1x1xf32>
      %38 = vector.broadcast %37 : f32 to vector<1x8x128xf32>
      %39 = arith.addf %33, %38 : vector<1x8x128xf32>
      %c0_15 = arith.constant 0 : index
      %c0_16 = arith.constant 0 : index
      %c0_17 = arith.constant 0 : index
      %40 = vector.load %arg4[%c0_15, %c0_16, %c0_17] : memref<1x8x128xf32, #tpu.memory_space<vmem>>, vector<1x8x128xf32>
      tpu.vector_store %arg4[%c0_15, %c0_16, %c0_17], %39 {strides = array<i32>} : memref<1x8x128xf32, #tpu.memory_space<vmem>>, vector<1x8x128xf32>,
    } else {
    }
    %true = arith.constant true
    %30 = arith.xori %27, %true : i1
    %31 = arith.extui %30 : i1 to i32
    %c0_i32_10 = arith.constant 0 : i32
    %32 = arith.cmpi ne, %31, %c0_i32_10 : i32
    scf.if %32 {
      %c16_i32_11 = arith.constant 16 : i32
      %33 = arith.muli %1, %c16_i32_11 : i32
      %34 = tpu.iota {dimensions = array<i32: 0>} : vector<16x1xi32>
      %35 = vector.broadcast %33 : i32 to vector<16x1xi32>
      %36 = arith.addi %35, %34 : vector<16x1xi32>
      %c0_12 = arith.constant 0 : index
      %c0_13 = arith.constant 0 : index
      %c0_14 = arith.constant 0 : index
      %37 = vector.load %arg4[%c0_12, %c0_13, %c0_14] : memref<1x8x128xf32, #tpu.memory_space<vmem>>, vector<1x8x128xf32>
      %c16_i32_15 = arith.constant 16 : i32
      %38 = vector.broadcast %c16_i32_15 : i32 to vector<16x1xi32>
      %39 = arith.cmpi slt, %36, %38 : vector<16x1xi32>
      %cst_16 = arith.constant 0.000000e+00 : f32
      %40 = vector.broadcast %cst_16 : f32 to vector<16x1xf32>
      %41 = arith.select %39, %24, %40 : vector<16x1xi1>, vector<16x1xf32>
      %42 = vector.shape_cast %41 : vector<16x1xf32> to vector<1x16x1xf32>
      %cst_17 = arith.constant dense<0.000000e+00> : vector<1xf32>
      %43 = vector.multi_reduction <add>, %42, %cst_17 [1, 2] : vector<1x16x1xf32> to vector<1xf32>
      %44 = vector.shape_cast %43 : vector<1xf32> to vector<1x1x1xf32>
      %45 = vector.extract %44[0, 0, 0] : f32 from vector<1x1x1xf32>
      %46 = vector.broadcast %45 : f32 to vector<1x8x128xf32>
      %47 = arith.addf %37, %46 : vector<1x8x128xf32>
      %c0_18 = arith.constant 0 : index
      %c0_19 = arith.constant 0 : index
      %c0_20 = arith.constant 0 : index
      %48 = vector.load %arg4[%c0_18, %c0_19, %c0_20] : memref<1x8x128xf32, #tpu.memory_space<vmem>>, vector<1x8x128xf32>
      tpu.vector_store %arg4[%c0_18, %c0_19, %c0_20], %47 {strides = array<i32>} : memref<1x8x128xf32, #tpu.memory_space<vmem>>, vector<1x8x128xf32>,
    } else {
    }
    return
  }
  func.func @transform_0(%arg0: i32, %arg1: i32) -> (i32, i32) {
    %c1_i32 = arith.constant 1 : i32
    %0 = arith.muli %arg0, %c1_i32 : i32
    %1 = arith.addi %0, %arg1 : i32
    %c0_i32 = arith.constant 0 : i32
    %2 = arith.minsi %1, %c0_i32 : i32
    %c0_i32_0 = arith.constant 0 : i32
    %c0_i32_1 = arith.constant 0 : i32
    return %2, %c0_i32_0 : i32, i32
  }
  func.func @transform_1(%arg0: i32, %arg1: i32) -> (i32, i32) {
    %c1_i32 = arith.constant 1 : i32
    %0 = arith.muli %arg0, %c1_i32 : i32
    %1 = arith.addi %0, %arg1 : i32
    %c0_i32 = arith.constant 0 : i32
    %2 = arith.minsi %1, %c0_i32 : i32
    %c0_i32_0 = arith.constant 0 : i32
    %c0_i32_1 = arith.constant 0 : i32
    return %2, %c0_i32_0 : i32, i32
  }
  func.func @transform_2(%arg0: i32, %arg1: i32) -> (i32, i32, i32) {
    %c0_i32 = arith.constant 0 : i32
    %c0_i32_0 = arith.constant 0 : i32
    %c0_i32_1 = arith.constant 0 : i32
    return %arg0, %c0_i32, %c0_i32_0 : i32, i32, i32
  }
}

</mosaic_0001>

<bundles_post_ra>
// kernel: tpu_custom_call.1
= control target key start
LH: loop header
LB: loop body
LE: loop exit
PB: predicated region body
PF: predicated region fallthrough
CT: control target
= control target key end

     0   :  { %vm98_vm0 = vcmask 261120   ;;  %v251_v4 = vmov 0   ;;  %s298_s0 = inlined_call_operand.vmem [shape: f32[16,32], index: 0, kind: input, shape index: {}]   ;;  %s299_s1 = inlined_call_operand.vmem [shape: s32[16,1], index: 1, kind: input, shape index: {}]   ;;  %s300_s2 = inlined_call_operand.hbm [shape: f32[1,8,128], index: 2, kind: output, shape index: {}]  }
   0x1   :  { %v82_v0 = vld [vmem:[%s298_s0] sm:$0xff]  ;;  %v83_v1 = vld [vmem:[%s298_s0 + $0x8] sm:$0xff]  ;;  %217 = vset.pattern.permute.xlu1 %v251_v4  ;;  %218 = vset.pattern.permute.xlu0 %v251_v4 }
   0x2   :  { %v84_v2 = vld [vmem:[%s299_s1] sm:$0xff]  ;;  %v105_v3 = vsel %vm98_vm0, %v82_v0, -inf }
   0x3   :  { %7 = vsyncpa [#allocation3], 0  ;;  %106 = vmax.xlane.f32.xlu0 %v105_v3  ;;  %89 = vperm.xlu1 %217, %v84_v2   ;;  %v108_v5 = vsel %vm98_vm0, %v83_v1, -inf  ;;  %v85_v6 = vld [vmem:[%s299_s1 + $0x8] sm:$0xff]  ;;  %v86_v11 = vlaneseq  ;;  %vm138_vm3 = vcmask 7168   ;;  %s252_s0 = smov [#allocation2]  }
   0x4   :  { %s192_s1 = sshll.u32 %s252_s0, 4  ;;  %s193_s1 = int_to_ptr.vmem [resolvable:$true] %s192_s1 }
   0x5   :  { %v87_v15 = vand.u32 127, %v86_v11  ;;  %s227_s18 = scalar_lea.vmem %s193_s1, 128  ;;  %p232_p1 = scmp.lt.s32.totalorder %s193_s1, %s193_s1 }
   0x6   :  { %p228_p0 = scmp.ne.s32.totalorder %s193_s1, %s227_s18  ;;  %p233_p2 = scmp.lt.s32.totalorder %s227_s18, %s227_s18 }
   0x7   :  { %109 = vmax.xlane.f32.xlu0 %v108_v5  ;;  %92 = vperm.xlu1 %217, %v85_v6  }
   0x8   :  { %p234_p3 = por %p233_p2, %p232_p1 }
   0xa   :  { %p235_p4 = pnand %p234_p3, %p228_p0 }
  0x82   :  { %v90_v14 = vpop.permute.xlu1 %89 }
  0x83   :  { %vm94_vm1 = vcmp.eq.s32.totalorder %v87_v15, %v90_v14 }
  0x84   :  { %v96_v18 = vsel %vm94_vm1, %v82_v0, 0.0 }
  0x85   :  { %v99_v20 = vsel %vm98_vm0, %v96_v18, 0.0 }
  0x86   :  { %v93_v16 = vpop.permute.xlu1 %92 }
  0x87   :  { %vm95_vm2 = vcmp.eq.s32.totalorder %v87_v15, %v93_v16 }
  0x88   :  { %v97_v22 = vsel %vm95_vm2, %v83_v1, 0.0 }
  0x89   :  { %v102_v24 = vsel %vm98_vm0, %v97_v22, 0.0 }
  0x90   :  { %v107_v7 = vpop.xlane.xlu0 %106 }
  0x91   :  { %v111_v8 = vsub.f32 %v82_v0, %v107_v7 }
  0x93   :  { %v113_v9 = vmul.f32 1.442695, %v111_v8 }
  0x94   :  { %v110_v10 = vpop.xlane.xlu0 %109 }
  0x95   :  { %219 = vpow2.f32 %v113_v9  ;;  %v112_v12 = vsub.f32 %v83_v1, %v110_v10 }
  0x97   :  { %v115_v13 = vmul.f32 1.442695, %v112_v12 }
  0x99   :  { %221 = vpow2.f32 %v115_v13 }
  0x9f   :  { %v220_v17 = vpop.eup %219 }
  0xa0   :  { %v117_v19 = vsel %vm98_vm0, %v220_v17, 0.0 }
  0xa1   :  { %118 = vadd.xlane.f32.xlu0 %v117_v19 }
  0xa3   :  { %v222_v21 = vpop.eup %221 }
  0xa4   :  { %v120_v23 = vsel %vm98_vm0, %v222_v21, 0.0 }
  0xa5   :  { %121 = vadd.xlane.f32.xlu1 %v120_v23  ;;  %100 = vadd.xlane.f32.xlu0 %v99_v20 }
  0xa9   :  { %103 = vadd.xlane.f32.xlu0 %v102_v24 }
 0x12e   :  { %v119_v25 = vpop.xlane.xlu0 %118 }
 0x12f   :  { %223 = vlog2.f32 %v119_v25 }
 0x132   :  { %v122_v26 = vpop.xlane.xlu1 %121  ;;  %v101_v27 = vpop.xlane.xlu0 %100 }
 0x133   :  { %225 = vlog2.f32 %v122_v26  ;;  %v123_v31 = vsub.f32 %v107_v7, %v101_v27 }
 0x136   :  { %v104_v30 = vpop.xlane.xlu0 %103 }
 0x137   :  { %v124_v35 = vsub.f32 %v110_v10, %v104_v30 }
 0x139   :  { %v224_v28 = vpop.eup %223 }
 0x13a   :  { %v126_v29 = vmul.f32 0.6931472, %v224_v28 }
 0x13c   :  { %v129_v34 = vadd.f32 %v126_v29, %v123_v31 }
 0x13d   :  { %v226_v32 = vpop.eup %225 }
 0x13e   :  { %v128_v33 = vmul.f32 0.6931472, %v226_v32  ;;  %v139_v37 = vsel %vm138_vm3, %v129_v34, 0.0 }
 0x140   :  { %v130_v36 = vadd.f32 %v128_v33, %v124_v35 }
 0x142   :  { %v140_v38 = vsel %vm138_vm3, %v130_v36, 0.0 }
 0x143   :  { %v141_v39 = vadd.f32 %v140_v38, %v139_v37 }
 0x145   :  { %142 = vadd.xlane.f32.xlu0 %v141_v39 }
 0x1d2   :  { %v143_v40 = vpop.xlane.xlu0 %142 }
 0x1d3   :  { %v144_v41 = vrot.slane %v143_v40, 4 }
 0x1d5   :  { %v145_v42 = vadd.f32 %v144_v41, %v143_v40 }
 0x1d7   :  { %v146_v43 = vrot.slane %v145_v42, 2 }
 0x1d9   :  { %v147_v44 = vadd.f32 %v146_v43, %v145_v42 }
 0x1db   :  { %v148_v45 = vrot.slane %v147_v44, 1 }
 0x1dd   :  { %v149_v46 = vadd.f32 %v148_v45, %v147_v44 }
 0x1df   :  { %212 = vpush %v149_v46 }
 0x210   :  { %s213_s17 = spop %212 }
 0x211   :  { %v151_v47 = vstv %s213_s17 }
 0x212   :  { %153 = vst [vmem:[#allocation2] sm:$0xff] %v151_v47 }
 0x213   :  { %238 = shalt.err (!%p235_p4)
}
 0x214   :  { %s239_s21 = scalar_lea.hbm %s300_s2, 128 }
 0x215   :  { %p240_p5 = scmp.ne.s32.totalorder %s300_s2, %s239_s21  ;;  %p243_p6 = scmp.lt.u32.totalorder %s239_s21, %s300_s2 }
 0x217   :  { %p245_p7 = pnand %p243_p6, %p240_p5 }
 0x219   :  { %248 = shalt.err (!%p245_p7)
}
 0x21a   :  { %195 = dma.vmem_to_hbm [thread:$0]  %s193_s1, 128, %s300_s2, [#allocation3]  }
 0x21b   :  { %249 = dma.done.wait [#allocation3], 128  }
 0x21c   :  { %250 = vsyncadd [#allocation3], 4294967168 }
 0x21d   :  { %199 = vsyncpa [#allocation3], 1 }

</bundles_post_ra>
